<compile_context>
chip_gen: v7x
topology: tpu7x:2x2x1
jax: 0.10.0
libtpu: 0.0.40
codegen_flags: <defaults>
</compile_context>

<pallas_src>
import jax
import jax.numpy as jnp
from jax.experimental import pallas as pl
from jax.experimental.pallas import tpu as pltpu


def pos_emb_kernel(row_ref, out_ref):
    # row_ref: (1, seq_len*F) VMEM tile — flattened first seq_len table rows.
    # out_ref: (b_tile, seq_len*F) VMEM tile — b_tile batch elements' outputs.
    # Pure sublane broadcast + lane-dense store; no MXU / iota / one-hot work.
    out_ref[...] = jnp.broadcast_to(row_ref[...], out_ref.shape)


def position_embedding(x, emb_table):
    """x: (N, seq_len) int array (values unused, only the shape matters).
    emb_table: (max_len, features_len) float32 embedding weights.
    Returns (N, seq_len, features_len) float32."""
    N, seq_len = x.shape
    max_len, F = emb_table.shape
    assert seq_len <= max_len, "seq_len must be <= max_len"

    L = seq_len * F  # flattened (lane-dense) feature width per batch element

    # Wrapper-side layout plumbing: slice only the rows we need and flatten
    # so the kernel sees a single lane-dense row to replicate.
    row = emb_table[:seq_len].reshape(1, L)

    # Batch tiling: write many rows per grid step (amortize grid overhead,
    # approach the HBM-write roofline).  If N is small, one step covers it
    # (block == full dim is always legal); otherwise use 512-row tiles
    # (multiple of 8) with the batch dim padded up to a tile multiple.
    if N <= 1024:
        b_tile = N
        n_pad = N
    else:
        b_tile = 512
        n_pad = pl.cdiv(N, b_tile) * b_tile

    grid = (n_pad // b_tile,)

    out_flat = pl.pallas_call(
        pos_emb_kernel,
        out_shape=jax.ShapeDtypeStruct((n_pad, L), emb_table.dtype),
        grid=grid,
        # Tiny constant input: (1, L) — block equals full array dims (legal),
        # index never changes across the grid.
        in_specs=[pl.BlockSpec((1, L), lambda i: (0, 0))],
        # Lane-dense output slab: last dim == full array dim L.
        out_specs=pl.BlockSpec((b_tile, L), lambda i: (i, 0)),
        compiler_params=pltpu.CompilerParams(
            dimension_semantics=("parallel",)),
    )(row)

    return out_flat[:N].reshape(N, seq_len, F)


if __name__ == "__main__":
    # Module hyper-params (synthetic, deterministic init)
    max_len = 16
    features_len = 32
    N = 2
    seq_len = 8

    key = jax.random.PRNGKey(0)
    k_emb, k_x = jax.random.split(key)

    # nn.Embedding(max_len, features_len).weight ~ N(0, 1), float32
    emb_table = jax.random.normal(k_emb, (max_len, features_len), dtype=jnp.float32)

    # Input token ids (values irrelevant to the forward pass, only the shape)
    x = jax.random.randint(k_x, (N, seq_len), 0, max_len, dtype=jnp.int32)

    out = position_embedding(x, emb_table)
    out = jax.block_until_ready(out)

    # Reference: embedding(arange(seq_len)) broadcast over batch
    ref = jnp.broadcast_to(emb_table[:seq_len][None], (N, seq_len, features_len))

    assert out.shape == (N, seq_len, features_len), out.shape
    assert out.dtype == jnp.float32, out.dtype
    assert jnp.allclose(out, ref, atol=1e-6, rtol=1e-6), "mismatch vs reference"

    print("KERNEL_OK")
</pallas_src>

<mosaic_0001>
module attributes {stable_mosaic.version = 11 : i64} {
  func.func @pos_emb_kernel(%arg0: i32, %arg1: memref<1x256xf32, #tpu.memory_space<vmem>>, %arg2: memref<2x256xf32, #tpu.memory_space<vmem>>) attributes {dimension_semantics = [#tpu.dimension_semantics<parallel>], iteration_bounds = array<i64: 1>, scalar_prefetch = 0 : i64, scratch_operands = 0 : i64, tpu.core_type = #tpu.core_type<tc>, window_params = [{pipeline_mode = #tpu.pipeline_mode<synchronous>, transform_indices = @transform_0, window_bounds = array<i64: 1, 256>}, {transform_indices = @transform_1, window_bounds = array<i64: 2, 256>}]} {
    %c0 = arith.constant 0 : index
    %c0_0 = arith.constant 0 : index
    %0 = vector.load %arg1[%c0, %c0_0] : memref<1x256xf32, #tpu.memory_space<vmem>>, vector<1x256xf32>
    %1 = vector.shape_cast %0 : vector<1x256xf32> to vector<1x256xf32>
    %2 = vector.broadcast %1 : vector<1x256xf32> to vector<2x256xf32>
    %c0_1 = arith.constant 0 : index
    %c0_2 = arith.constant 0 : index
    %3 = vector.load %arg2[%c0_1, %c0_2] : memref<2x256xf32, #tpu.memory_space<vmem>>, vector<2x256xf32>
    tpu.vector_store %arg2[%c0_1, %c0_2], %2 {strides = array<i32>} : memref<2x256xf32, #tpu.memory_space<vmem>>, vector<2x256xf32>,
    return
  }
  func.func @transform_0(%arg0: i32) -> (i32, i32) {
    %c0_i32 = arith.constant 0 : i32
    %c0_i32_0 = arith.constant 0 : i32
    %c0_i32_1 = arith.constant 0 : i32
    return %c0_i32, %c0_i32_0 : i32, i32
  }
  func.func @transform_1(%arg0: i32) -> (i32, i32) {
    %c0_i32 = arith.constant 0 : i32
    %c0_i32_0 = arith.constant 0 : i32
    return %arg0, %c0_i32 : i32, i32
  }
}

</mosaic_0001>

<bundles_post_ra>
// kernel: tpu_custom_call.1
= control target key start
LH: loop header
LB: loop body
LE: loop exit
PB: predicated region body
PF: predicated region fallthrough
CT: control target
= control target key end

     0   :  { %6 = vsyncpa [#allocation3], 0  ;;  %s143_s0 = inlined_call_operand.hbm [shape: f32[1,256], index: 0, kind: input, shape index: {}]   ;;  %s144_s1 = inlined_call_operand.hbm [shape: f32[2,256], index: 1, kind: output, shape index: {}]  }
   0x1   :  { %7 = vsyncpa [#allocation4], 0  ;;  %s107_s6 = smov [#allocation2]   ;;  %s59_s10 = scalar_lea.hbm %s143_s0, 32 }
   0x2   :  { %s14_s7 = sshll.u32 %s107_s6, 4  ;;  %p60_p0 = scmp.ne.s32.totalorder %s143_s0, %s59_s10  ;;  %s15_s7 = int_to_ptr.vmem [resolvable:$true] %s14_s7 }
   0x3   :  { %p63_p1 = scmp.lt.u32.totalorder %s59_s10, %s143_s0 }
   0x5   :  { %p65_p2 = pnand %p63_p1, %p60_p0 }
   0x7   :  { %68 = shalt.err (!%p65_p2)
}
   0x8   :  { %s69_s15 = scalar_lea.vmem %s15_s7, 32  ;;  %p74_p4 = scmp.lt.s32.totalorder %s15_s7, %s15_s7 }
   0x9   :  { %p70_p3 = scmp.ne.s32.totalorder %s15_s7, %s69_s15  ;;  %p75_p5 = scmp.lt.s32.totalorder %s69_s15, %s69_s15 }
   0xb   :  { %p76_p6 = por %p75_p5, %p74_p4 }
   0xd   :  { %p77_p7 = pnand %p76_p6, %p70_p3 }
   0xf   :  { %80 = shalt.err (!%p77_p7)
}
  0x10   :  { %17 = dma.hbm_to_vmem [thread:$0]  %s143_s0, 32, %s15_s7, [#allocation3]  }
  0x11   :  { %103 = dma.done.wait [#allocation3], 32  }
  0x12   :  { %104 = vsyncadd [#allocation3], 4294967264  ;;  %v23_v0 = vlaneseq  ;;  %v21_v4 = vld [vmem:[#allocation2] sm:$0x3]  ;;  %s108_s18 = smov [#allocation5]  }
  0x13   :  { %s47_s19 = sshll.u32 %s108_s18, 4  ;;  %s48_s19 = int_to_ptr.vmem [resolvable:$true] %s47_s19 }
  0x14   :  { %v24_v1 = vshrl.u32 %v23_v0, 7  ;;  %s81_s20 = scalar_lea.vmem %s48_s19, 64  ;;  %p86_p9 = scmp.lt.s32.totalorder %s48_s19, %s48_s19 }
  0x15   :  { %p82_p8 = scmp.ne.s32.totalorder %s48_s19, %s81_s20  ;;  %p87_p10 = scmp.lt.s32.totalorder %s81_s20, %s81_s20 }
  0x16   :  { %v25_v2 = vsub.s32 0, %v24_v1  ;;  %v29_v3 = vsub.s32 1, %v24_v1 }
  0x17   :  { %p88_p11 = por %p87_p10, %p86_p9 }
  0x18   :  { %v26_v5 = vrot.slane %v21_v4, %v25_v2  ;;  %v30_v6 = vrot.slane %v21_v4, %v29_v3 }
  0x19   :  { %p89_p12 = pnand %p88_p11, %p82_p8 }
  0x1a   :  { %v31_v7 = vcombine.low %v26_v5, %v30_v6 }
  0x1c   :  { %56 = vst.sshfl [vmem:[#allocation5] sm:$0x33 pattern:$0x76325410] %v31_v7 }
  0x1d   :  { %92 = shalt.err (!%p89_p12)
}
  0x1e   :  { %s93_s22 = scalar_lea.hbm %s144_s1, 64 }
  0x1f   :  { %p94_p13 = scmp.ne.s32.totalorder %s144_s1, %s93_s22  ;;  %p97_p0 = scmp.lt.u32.totalorder %s93_s22, %s144_s1 }
  0x21   :  { %p99_p1 = pnand %p97_p0, %p94_p13 }
  0x23   :  { %102 = shalt.err (!%p99_p1)
}
  0x24   :  { %50 = dma.vmem_to_hbm [thread:$0]  %s48_s19, 64, %s144_s1, [#allocation4]  }
  0x25   :  { %105 = dma.done.wait [#allocation4], 64  }
  0x26   :  { %106 = vsyncadd [#allocation4], 4294967232 }
  0x27   :  { %54 = vsyncpa [#allocation3], 1 }
  0x28   :  { %55 = vsyncpa [#allocation4], 1 }

</bundles_post_ra>
